<compile_context>
chip_gen: v7x
topology: tpu7x:2x2x1
jax: 0.10.0
libtpu: 0.0.40
codegen_flags: <defaults>
</compile_context>

<pallas_src>
import functools

import jax
import jax.numpy as jnp
import numpy as np
from jax.experimental import pallas as pl
from jax.experimental.pallas import tpu as pltpu

_NEG = -1e30  # additive mask value for invalid pool positions


# ----------------------------------------------------------------------------
# Fused kernel.
#   emb_ref   : (B*slen, dim_e) f32       embedded tokens (flattened batch)
#   wconv_ref : (k_max*dim_e, sum_f)      im2col-packed conv weights (mxu_dtype)
#   bconv_ref : (1, sum_f) f32            concatenated conv biases
#   mask_ref  : (1, slen, sum_f) f32      0 on valid positions, -1e30 on invalid
#   w1_ref    : (sum_f, hidden) mxu_dtype   b1_ref : (1, hidden) f32
#   w2_ref    : (hidden, out)   mxu_dtype   b2_ref : (1, out) f32
#   out_ref   : (B, out) f32              hid_ref : (B, hidden) f32
# ----------------------------------------------------------------------------
def _textcnn_kernel(emb_ref, wconv_ref, bconv_ref, mask_ref, w1_ref, b1_ref,
                    w2_ref, b2_ref, out_ref, hid_ref, *, batch, slen, k_max,
                    mxu_dtype):
    f32 = jnp.float32
    n = batch * slen
    emb = emb_ref[...]                                           # (n, dim_e) f32

    # --- im2col via sublane rotates on the XLU (co-issues with MXU work) ---
    # Tap j needs row p -> emb[p + j]; roll by (n - j) == jnp.roll(emb, -j, 0).
    # Wrapped / cross-sample rows only reach positions >= slen - k + 1 for any
    # bank whose tap j is non-zero, and those positions are masked before pool.
    taps = [emb]
    for j in range(1, k_max):                                    # k_max small, unrolled
        taps.append(pltpu.roll(emb, shift=n - j, axis=0))
    x = jnp.concatenate(taps, axis=1)                            # (n, k_max*dim_e)

    # --- single deep-K MXU push for all conv banks; f32 accumulation ---
    acc = jnp.dot(x.astype(mxu_dtype), wconv_ref[...],
                  preferred_element_type=f32)                    # (n, sum_f)
    acc = jnp.maximum(acc + bconv_ref[...], 0.0)                 # conv bias + ReLU

    # --- per-sample global max-pool: one reshape + one reduction ---
    sum_f = acc.shape[-1]
    acc3 = acc.reshape(batch, slen, sum_f) + mask_ref[...]       # (B, slen, sum_f)
    pooled = jnp.max(acc3, axis=1)                               # (B, sum_f)

    # --- MLP head (dropout / dropout2 are identity at inference) ---
    h = jnp.dot(pooled.astype(mxu_dtype), w1_ref[...],
                preferred_element_type=f32) + b1_ref[...]
    h = jnp.maximum(h, 0.0)                                      # fc_act = relu
    hid_ref[...] = h
    out_ref[...] = jnp.dot(h.astype(mxu_dtype), w2_ref[...],
                           preferred_element_type=f32) + b2_ref[...]


# ----------------------------------------------------------------------------
# Parameter packing: zero-pad conv taps to a common k_max, concatenate banks,
# and reshape to ONE im2col weight slab (k_max*dim_e, sum_f).
# ----------------------------------------------------------------------------
def pack_conv_params(convs, dim_e, mxu_dtype=jnp.bfloat16):
    kernel_sizes = tuple(int(k) for (k, _, _) in convs)
    channels_outs = tuple(int(w.shape[-1]) for (_, w, _) in convs)
    k_max = max(kernel_sizes)
    sum_f = sum(channels_outs)
    w_taps = np.zeros((k_max, dim_e, sum_f), np.float32)
    b_cat = np.zeros((1, sum_f), np.float32)
    off = 0
    for (k, w, b) in convs:
        f = w.shape[-1]
        w_taps[:k, :, off:off + f] = np.asarray(w, np.float32)
        b_cat[:, off:off + f] = np.asarray(b, np.float32)
        off += f
    w_im2col = jnp.asarray(w_taps.reshape(k_max * dim_e, sum_f), mxu_dtype)
    return w_im2col, jnp.asarray(b_cat), kernel_sizes, channels_outs


def build_pool_mask(slen, kernel_sizes, channels_outs):
    """Additive mask: 0 on valid conv outputs, -1e30 past l_out = slen - k + 1."""
    sum_f = sum(channels_outs)
    mask = np.zeros((1, slen, sum_f), np.float32)
    off = 0
    for k, f in zip(kernel_sizes, channels_outs):
        assert slen >= k, "slen must be >= every conv kernel size"
        mask[:, slen - k + 1:, off:off + f] = _NEG
        off += f
    return jnp.asarray(mask)


# ----------------------------------------------------------------------------
# Forward pass: XLA embedding gather (table stays in HBM) + one pallas_call.
# ----------------------------------------------------------------------------
@functools.partial(jax.jit, static_argnames=("kernel_sizes", "channels_outs"))
def textcnn_forward(params, inputs, *, kernel_sizes, channels_outs):
    emb_table = params["embeddings"]
    dim_e = emb_table.shape[1]
    batch, slen = inputs.shape
    assert slen >= max(kernel_sizes), "slen must be >= every conv kernel size"
    w_conv = params["w_conv"]
    k_dim, sum_f = w_conv.shape
    k_max = k_dim // dim_e
    assert sum_f == sum(channels_outs)
    hidden = params["w1"].shape[1]
    out_size = params["w2"].shape[1]
    n = batch * slen
    mxu_dtype = w_conv.dtype

    # Embedding gather stays in XLA: the table never enters VMEM and the
    # O(n*vocab) one-hot is gone.
    emb_rows = jnp.take(emb_table, inputs.reshape(-1).astype(jnp.int32),
                        axis=0).astype(jnp.float32)              # (n, dim_e)

    kern = functools.partial(_textcnn_kernel, batch=batch, slen=slen,
                             k_max=k_max, mxu_dtype=mxu_dtype)

    args = (emb_rows, w_conv, params["b_conv"], params["pool_mask"],
            params["w1"], params["b1"], params["w2"], params["b2"])
    flops = 2 * (n * k_max * dim_e * sum_f + batch * sum_f * hidden
                 + batch * hidden * out_size)
    bytes_accessed = sum(int(a.size) * a.dtype.itemsize for a in args)
    bytes_accessed += 4 * batch * (out_size + hidden)

    out, hid = pl.pallas_call(
        kern,
        out_shape=(jax.ShapeDtypeStruct((batch, out_size), jnp.float32),
                   jax.ShapeDtypeStruct((batch, hidden), jnp.float32)),
        in_specs=[pl.BlockSpec(memory_space=pltpu.MemorySpace.VMEM)] * 8,
        out_specs=(pl.BlockSpec(memory_space=pltpu.MemorySpace.VMEM),
                   pl.BlockSpec(memory_space=pltpu.MemorySpace.VMEM)),
        cost_estimate=pl.CostEstimate(flops=flops, transcendentals=0,
                                      bytes_accessed=bytes_accessed),
    )(*args)
    return out, hid


# Pure-JAX reference (original per-bank weights). Contraction operands are cast
# to the same MXU dtype as the kernel so the check stays tight with bf16.
def reference_forward(embeddings, convs, w1, b1, w2, b2, inputs,
                      mxu_dtype=jnp.float32):
    f32 = jnp.float32
    cast = lambda a: a.astype(mxu_dtype)
    emb = embeddings[inputs]                                     # (B, slen, dim_e)
    feats = []
    for (k, w, b) in convs:
        slen = emb.shape[1]
        l_out = slen - k + 1
        acc = jnp.zeros((emb.shape[0], l_out, w.shape[-1]), f32)
        for j in range(k):
            acc = acc + jnp.einsum("bld,df->blf", cast(emb[:, j:j + l_out, :]),
                                   cast(w[j]), preferred_element_type=f32)
        acc = jnp.maximum(acc + b.reshape(1, 1, -1), 0.0)
        feats.append(jnp.max(acc, axis=1))
    x = jnp.concatenate(feats, axis=1)
    h = jnp.maximum(jnp.dot(cast(x), cast(w1), preferred_element_type=f32) + b1, 0.0)
    out = jnp.dot(cast(h), cast(w2), preferred_element_type=f32) + b2
    return out, h


if __name__ == "__main__":
    # Small, module-consistent shapes.
    vocab, dim_e, slen, batch = 50, 32, 16, 2
    kernel_sizes = (3, 4, 5)
    channels_outs = (16, 16, 16)
    hidden_size, output_size = 32, 4
    mxu_dtype = jnp.bfloat16   # MXU-input precision; accumulation stays f32

    key = jax.random.PRNGKey(0)
    keys = jax.random.split(key, 16)

    embeddings = jax.random.normal(keys[0], (vocab, dim_e), jnp.float32) * 0.1
    convs = []
    for i, (k, f) in enumerate(zip(kernel_sizes, channels_outs)):
        # layout (k, dim_e, f)  ==  PyTorch Conv1d weight (f, dim_e, k) transposed
        w = jax.random.normal(keys[1 + 2 * i], (k, dim_e, f), jnp.float32) * 0.1
        b = jax.random.normal(keys[2 + 2 * i], (1, f), jnp.float32) * 0.1
        convs.append((k, w, b))
    dim_sum_filter = sum(channels_outs)
    w1 = jax.random.normal(keys[8], (dim_sum_filter, hidden_size), jnp.float32) * 0.1
    b1 = jax.random.normal(keys[9], (1, hidden_size), jnp.float32) * 0.1
    w2 = jax.random.normal(keys[10], (hidden_size, output_size), jnp.float32) * 0.1
    b2 = jax.random.normal(keys[11], (1, output_size), jnp.float32) * 0.1

    inputs = jax.random.randint(keys[12], (batch, slen), 0, vocab, jnp.int32)

    w_conv, b_conv, ks, cs = pack_conv_params(convs, dim_e, mxu_dtype)
    pool_mask = build_pool_mask(slen, ks, cs)
    params = dict(embeddings=embeddings, w_conv=w_conv, b_conv=b_conv,
                  pool_mask=pool_mask,
                  w1=w1.astype(mxu_dtype), b1=b1,
                  w2=w2.astype(mxu_dtype), b2=b2)

    out, hid = textcnn_forward(params, inputs, kernel_sizes=ks, channels_outs=cs)
    jax.block_until_ready((out, hid))

    ref_out, ref_hid = reference_forward(embeddings, convs, w1, b1, w2, b2,
                                         inputs, mxu_dtype=mxu_dtype)
    np.testing.assert_allclose(np.asarray(out), np.asarray(ref_out),
                               rtol=5e-3, atol=1e-3)
    np.testing.assert_allclose(np.asarray(hid), np.asarray(ref_hid),
                               rtol=5e-3, atol=1e-3)
    print("KERNEL_OK")
</pallas_src>

<mosaic_0001>
module attributes {stable_mosaic.version = 11 : i64} {
  func.func @_textcnn_kernel(%arg0: memref<32x32xf32, #tpu.memory_space<vmem>>, %arg1: memref<160x48xbf16, #tpu.memory_space<vmem>>, %arg2: memref<1x48xf32, #tpu.memory_space<vmem>>, %arg3: memref<1x16x48xf32, #tpu.memory_space<vmem>>, %arg4: memref<48x32xbf16, #tpu.memory_space<vmem>>, %arg5: memref<1x32xf32, #tpu.memory_space<vmem>>, %arg6: memref<32x4xbf16, #tpu.memory_space<vmem>>, %arg7: memref<1x4xf32, #tpu.memory_space<vmem>>, %arg8: memref<2x4xf32, #tpu.memory_space<vmem>>, %arg9: memref<2x32xf32, #tpu.memory_space<vmem>>) attributes {dimension_semantics = [], scalar_prefetch = 0 : i64, scratch_operands = 0 : i64, tpu.core_type = #tpu.core_type<tc>} {
    %c0 = arith.constant 0 : index
    %c0_0 = arith.constant 0 : index
    %0 = vector.load %arg0[%c0, %c0_0] : memref<32x32xf32, #tpu.memory_space<vmem>>, vector<32x32xf32>
    %c31_i32 = arith.constant 31 : i32
    %1 = tpu.dynamic_rotate %0 by %c31_i32 dim 0 : vector<32x32xf32>, i32 -> vector<32x32xf32>
    %c30_i32 = arith.constant 30 : i32
    %2 = tpu.dynamic_rotate %0 by %c30_i32 dim 0 : vector<32x32xf32>, i32 -> vector<32x32xf32>
    %c29_i32 = arith.constant 29 : i32
    %3 = tpu.dynamic_rotate %0 by %c29_i32 dim 0 : vector<32x32xf32>, i32 -> vector<32x32xf32>
    %c28_i32 = arith.constant 28 : i32
    %4 = tpu.dynamic_rotate %0 by %c28_i32 dim 0 : vector<32x32xf32>, i32 -> vector<32x32xf32>
    %5 = tpu.concatenate %0, %1, %2, %3, %4 in 1 : vector<32x32xf32>, vector<32x32xf32>, vector<32x32xf32>, vector<32x32xf32>, vector<32x32xf32> -> vector<32x160xf32>
    %6 = arith.truncf %5 : vector<32x160xf32> to vector<32x160xbf16>
    %c0_1 = arith.constant 0 : index
    %c0_2 = arith.constant 0 : index
    %7 = vector.load %arg1[%c0_1, %c0_2] : memref<160x48xbf16, #tpu.memory_space<vmem>>, vector<160x48xbf16>
    %cst = arith.constant dense<0.000000e+00> : vector<32x48xf32>
    %8 = tpu.matmul %6, %7, %cst {dimension_numbers = #tpu.dot_dimension_numbers<[1], [0], [0], [1], [0, 0, 1, 1], [], []>} : vector<32x160xbf16>, vector<160x48xbf16>, vector<32x48xf32> -> vector<32x48xf32>
    %c0_3 = arith.constant 0 : index
    %c0_4 = arith.constant 0 : index
    %9 = vector.load %arg2[%c0_3, %c0_4] : memref<1x48xf32, #tpu.memory_space<vmem>>, vector<1x48xf32>
    %10 = vector.broadcast %9 : vector<1x48xf32> to vector<32x48xf32>
    %11 = arith.addf %8, %10 : vector<32x48xf32>
    %cst_5 = arith.constant 0.000000e+00 : f32
    %12 = vector.broadcast %cst_5 : f32 to vector<32x48xf32>
    %13 = arith.maximumf %11, %12 : vector<32x48xf32>
    %14 = vector.shape_cast %13 : vector<32x48xf32> to vector<2x16x48xf32>
    %c0_6 = arith.constant 0 : index
    %c0_7 = arith.constant 0 : index
    %c0_8 = arith.constant 0 : index
    %15 = vector.load %arg3[%c0_6, %c0_7, %c0_8] : memref<1x16x48xf32, #tpu.memory_space<vmem>>, vector<1x16x48xf32>
    %16 = vector.broadcast %15 : vector<1x16x48xf32> to vector<2x16x48xf32>
    %17 = arith.addf %14, %16 : vector<2x16x48xf32>
    %cst_9 = arith.constant dense<0xFF800000> : vector<2x48xf32>
    %18 = vector.multi_reduction <maximumf>, %17, %cst_9 [1] : vector<2x16x48xf32> to vector<2x48xf32>
    %19 = arith.truncf %18 : vector<2x48xf32> to vector<2x48xbf16>
    %c0_10 = arith.constant 0 : index
    %c0_11 = arith.constant 0 : index
    %20 = vector.load %arg4[%c0_10, %c0_11] : memref<48x32xbf16, #tpu.memory_space<vmem>>, vector<48x32xbf16>
    %cst_12 = arith.constant dense<0.000000e+00> : vector<2x32xf32>
    %21 = tpu.matmul %19, %20, %cst_12 {dimension_numbers = #tpu.dot_dimension_numbers<[1], [0], [0], [1], [0, 0, 1, 1], [], []>} : vector<2x48xbf16>, vector<48x32xbf16>, vector<2x32xf32> -> vector<2x32xf32>
    %c0_13 = arith.constant 0 : index
    %c0_14 = arith.constant 0 : index
    %22 = vector.load %arg5[%c0_13, %c0_14] : memref<1x32xf32, #tpu.memory_space<vmem>>, vector<1x32xf32>
    %23 = vector.broadcast %22 : vector<1x32xf32> to vector<2x32xf32>
    %24 = arith.addf %21, %23 : vector<2x32xf32>
    %cst_15 = arith.constant 0.000000e+00 : f32
    %25 = vector.broadcast %cst_15 : f32 to vector<2x32xf32>
    %26 = arith.maximumf %24, %25 : vector<2x32xf32>
    %c0_16 = arith.constant 0 : index
    %c0_17 = arith.constant 0 : index
    %27 = vector.load %arg9[%c0_16, %c0_17] : memref<2x32xf32, #tpu.memory_space<vmem>>, vector<2x32xf32>
    tpu.vector_store %arg9[%c0_16, %c0_17], %26 {strides = array<i32>} : memref<2x32xf32, #tpu.memory_space<vmem>>, vector<2x32xf32>,
    %28 = arith.truncf %26 : vector<2x32xf32> to vector<2x32xbf16>
    %c0_18 = arith.constant 0 : index
    %c0_19 = arith.constant 0 : index
    %29 = vector.load %arg6[%c0_18, %c0_19] : memref<32x4xbf16, #tpu.memory_space<vmem>>, vector<32x4xbf16>
    %cst_20 = arith.constant dense<0.000000e+00> : vector<2x4xf32>
    %30 = tpu.matmul %28, %29, %cst_20 {dimension_numbers = #tpu.dot_dimension_numbers<[1], [0], [0], [1], [0, 0, 1, 1], [], []>} : vector<2x32xbf16>, vector<32x4xbf16>, vector<2x4xf32> -> vector<2x4xf32>
    %c0_21 = arith.constant 0 : index
    %c0_22 = arith.constant 0 : index
    %31 = vector.load %arg7[%c0_21, %c0_22] : memref<1x4xf32, #tpu.memory_space<vmem>>, vector<1x4xf32>
    %32 = vector.broadcast %31 : vector<1x4xf32> to vector<2x4xf32>
    %33 = arith.addf %30, %32 : vector<2x4xf32>
    %c0_23 = arith.constant 0 : index
    %c0_24 = arith.constant 0 : index
    %34 = vector.load %arg8[%c0_23, %c0_24] : memref<2x4xf32, #tpu.memory_space<vmem>>, vector<2x4xf32>
    tpu.vector_store %arg8[%c0_23, %c0_24], %33 {strides = array<i32>} : memref<2x4xf32, #tpu.memory_space<vmem>>, vector<2x4xf32>,
    return
  }
}

</mosaic_0001>

<bundles_post_ra>
// kernel: textcnn_forward.1
= control target key start
LH: loop header
LB: loop body
LE: loop exit
PB: predicated region body
PF: predicated region fallthrough
CT: control target
= control target key end

     0   :  { %15 = vsyncpa [#allocation3], 0  ;;  %v42_v3 = vlaneseq  ;;  %v645_v9 = vmov 0   ;;  %s646_s20 = smov 32   ;;  %s647_s21 = smov 96   ;;  %vm124_vm4 = vcmask 261120   ;;  %s878_s0 = inlined_call_operand.vmem [shape: f32[32,32], index: 0, kind: input, shape index: {}]   ;;  %s879_s1 = inlined_call_operand.vmem [shape: bf16[160,48], index: 1, kind: input, shape index: {}]   ;;  %s880_s2 = inlined_call_operand.vmem [shape: f32[1,48], index: 2, kind: input, shape index: {}]   ;;  %s881_s3 = inlined_call_operand.vmem [shape: f32[1,16,48], index: 3, kind: input, shape index: {}]   ;;  %s882_s4 = inlined_call_operand.vmem [shape: bf16[48,32], index: 4, kind: input, shape index: {}]   ;;  %s883_s5 = inlined_call_operand.vmem [shape: f32[1,32], index: 5, kind: input, shape index: {}]   ;;  %s884_s6 = inlined_call_operand.vmem [shape: bf16[32,4], index: 6, kind: input, shape index: {}]   ;;  %s885_s7 = inlined_call_operand.vmem [shape: f32[1,4], index: 7, kind: input, shape index: {}]   ;;  %s886_s8 = inlined_call_operand.hbm [shape: f32[2,4], index: 8, kind: output, shape index: {0}]   ;;  %s887_s9 = inlined_call_operand.hbm [shape: f32[2,32], index: 9, kind: output, shape index: {1}]  }
   0x1   :  { %v706_v0 = vld [vmem:[%s878_s0] sm:$0xff]  ;;  %v711_v1 = vld [vmem:[%s878_s0 + $0x8] sm:$0xff]  ;;  %v716_v2 = vld [vmem:[%s878_s0 + $0x10] sm:$0xff]  ;;  %236 = vmatprep.subr.bf16.mxu0 %v645_v9  ;;  %s648_s24 = smov 64  }
   0x2   :  { %v38_v4 = vrot.slane %v706_v0, 1  ;;  %v39_v5 = vrot.slane %v711_v1, 1  ;;  %v40_v6 = vrot.slane %v716_v2, 1  ;;  %v58_v7 = vrot.slane %v706_v0, 3  ;;  %v725_v8 = vld [vmem:[%s878_s0 + $0x18] sm:$0xff]  ;;  %v582_v19 = vld [vmem:[%s879_s1] sm:$0xff]  }
   0x3   :  { %v43_v10 = vshrl.u32 %v42_v3, 7  ;;  %v59_v11 = vrot.slane %v711_v1, 3  ;;  %v60_v12 = vrot.slane %v716_v2, 3  ;;  %v49_v13 = vrot.slane %v706_v0, 2  ;;  %237 = vmatpush1.bf16.msra.mxu0 %v582_v19  ;;  %v583_v28 = vld [vmem:[%s879_s1 + $0x8] sm:$0xff]   ;;  %v584_v37 = vld [vmem:[%s879_s1 + $0x10] sm:$0xff]  }
   0x4   :  { %v50_v14 = vrot.slane %v711_v1, 2  ;;  %v51_v15 = vrot.slane %v716_v2, 2  ;;  %v41_v16 = vrot.slane %v725_v8, 1  ;;  %v52_v17 = vrot.slane %v725_v8, 2  ;;  %238 = vmatprep.subr.bf16.mxu0 %v645_v9  ;;  %v585_v44 = vld [vmem:[%s879_s1 + $0x18] sm:$0xff]   ;;  %v586_v51 = vld [vmem:[%s879_s1 + $0x20] sm:$0xff]  }
   0x5   :  { %vm44_vm0 = vcmp.lt.s32.totalorder %v43_v10, 7  ;;  %vm62_vm1 = vcmp.lt.s32.totalorder %v43_v10, 5  ;;  %vm53_vm2 = vcmp.lt.s32.totalorder %v43_v10, 6  ;;  %v61_v18 = vrot.slane %v725_v8, 3 }
   0x6   :  { %v46_v20 = vsel %vm44_vm0, %v39_v5, %v40_v6  ;;  %v47_v21 = vsel %vm44_vm0, %v38_v4, %v39_v5  ;;  %v64_v22 = vsel %vm62_vm1, %v59_v11, %v60_v12  ;;  %v65_v23 = vsel %vm62_vm1, %v58_v7, %v59_v11 }
   0x7   :  { %v552_v24 = vpack.i.bf16 %v46_v20, %v47_v21  ;;  %v562_v25 = vpack.i.bf16 %v64_v22, %v65_v23  ;;  %v55_v26 = vsel %vm53_vm2, %v50_v14, %v51_v15  ;;  %v56_v27 = vsel %vm53_vm2, %v49_v13, %v50_v14  ;;  %239 = vmatpush1.bf16.msra.mxu0 %v583_v28 }
   0x8   :  { %v45_v29 = vsel %vm44_vm0, %v40_v6, %v41_v16  ;;  %v48_v30 = vsel %vm44_vm0, %v41_v16, %v38_v4  ;;  %v557_v31 = vpack.i.bf16 %v55_v26, %v56_v27  ;;  %v54_v33 = vsel %vm53_vm2, %v51_v15, %v52_v17  ;;  %240 = vmatprep.subr.bf16.mxu0 %v645_v9 }
   0x9   :  { %553 = vrot.lane.b32.xlu0 %v552_v24, %s646_s20  ;;  %563 = vrot.lane.b32.xlu1 %v562_v25, %s647_s21  ;;  %v567_v32 = vpack.i.bf16 %v48_v30, %v45_v29  ;;  %v57_v34 = vsel %vm53_vm2, %v52_v17, %v49_v13  ;;  %v63_v35 = vsel %vm62_vm1, %v60_v12, %v61_v18  ;;  %v67_v38 = vrot.slane %v706_v0, 4 }
   0xa   :  { %v66_v36 = vsel %vm62_vm1, %v61_v18, %v58_v7  ;;  %v68_v39 = vrot.slane %v711_v1, 4  ;;  %v572_v40 = vpack.i.bf16 %v57_v34, %v54_v33  ;;  %v69_v42 = vrot.slane %v716_v2, 4 }
   0xb   :  { %v577_v41 = vpack.i.bf16 %v66_v36, %v63_v35  ;;  %vm71_vm3 = vcmp.lt.s32.totalorder %v43_v10, 4  ;;  %241 = vmatpush1.bf16.msra.mxu0 %v584_v37  ;;  %v70_v46 = vrot.slane %v725_v8, 4 }
   0xc   :  { %v74_v43 = vsel %vm71_vm3, %v67_v38, %v68_v39  ;;  %v73_v45 = vsel %vm71_vm3, %v68_v39, %v69_v42  ;;  %242 = vmatprep.subr.bf16.mxu0 %v645_v9 }
   0xd   :  { %558 = vrot.lane.b32.xlu0 %v557_v31, %s648_s24  ;;  %568 = vrot.lane.b32.xlu1 %v567_v32, %s646_s20  ;;  %v140_v47 = vpack.c.bf16 %v73_v45, %v74_v43  ;;  %v72_v48 = vsel %vm71_vm3, %v69_v42, %v70_v46  ;;  %v75_v49 = vsel %vm71_vm3, %v70_v46, %v67_v38 }
   0xe   :  { %v142_v50 = vpack.c.bf16 %v75_v49, %v72_v48 }
   0xf   :  { %508 = vmatprep.mubr.msk.bf16.mxu0 %vm124_vm4, %v140_v47  ;;  %243 = vmatpush1.bf16.msra.mxu0 %v585_v44 }
  0x11   :  { %573 = vrot.lane.b32.xlu0 %v572_v40, %s648_s24  ;;  %578 = vrot.lane.b32.xlu1 %v577_v41, %s647_s21 }
  0x12   :  { %16 = vsyncpa [#allocation5], 0  ;;  %244 = vmatprep.subr.bf16.mxu0 %v645_v9  ;;  %v587_v52 = vld [vmem:[%s879_s1 + $0x28] sm:$0xff]   ;;  %v588_v53 = vld [vmem:[%s879_s1 + $0x30] sm:$0xff]   ;;  %vm129_vm5 = vcmask 523264   ;;  %vm134_vm6 = vcmask 785408  }
  0x13   :  { %245 = vmatpush1.bf16.msra.mxu0 %v586_v51  ;;  %v589_v54 = vld [vmem:[%s879_s1 + $0x38] sm:$0xff]   ;;  %v590_v55 = vld [vmem:[%s879_s1 + $0x40] sm:$0xff]   ;;  %v591_v56 = vld [vmem:[%s879_s1 + $0x48] sm:$0xff]   ;;  %v649_v26 = vmov 0.0   ;;  %vm650_vm7 = vmmov 0   ;;  %vm295_vm8 = vcmask 392192  }
  0x14   :  { %246 = vmatprep.subr.bf16.mxu0 %v645_v9  ;;  %526 = vmatprep.subr.bf16.mxu1 %v649_v26  ;;  %v593_v27 = vld [vmem:[%s882_s4 + $0x8] sm:$0xff]   ;;  %v594_v28 = vld [vmem:[%s882_s4 + $0x10] sm:$0xff]   ;;  %v497_v29 = vld [vmem:[%s880_s2] ss:$0 sm:$0xff]  ;;  %vm333_vm9 = vcmask 1041409   ;;  %vm398_vm10 = vcmask 254976  }
  0x15   :  { %532 = vmatprep.mubr.msk.bf16.mxu1 %vm650_vm7, %v649_v26  ;;  %v289_v33 = vld [vmem:[%s881_s3] sm:$0xff]  ;;  %v290_v38 = vld [vmem:[%s881_s3 + $0x8] sm:$0xff]  ;;  %s651_s10 = smov [#allocation4]  }
  0x16   :  { %s485_s11 = sshll.u32 %s651_s10, 4  ;;  %s486_s11 = int_to_ptr.vmem [resolvable:$true] %s485_s11 }
  0x17   :  { %247 = vmatpush1.bf16.msra.mxu0 %v587_v52  ;;  %p602_p1 = scmp.lt.s32.totalorder %s486_s11, %s486_s11 }
  0x18   :  { %248 = vmatprep.subr.bf16.mxu0 %v645_v9 }
  0x1b   :  { %249 = vmatpush1.bf16.msra.mxu0 %v588_v53 }
  0x1c   :  { %250 = vmatprep.subr.bf16.mxu0 %v645_v9 }
  0x1f   :  { %251 = vmatpush1.bf16.msra.mxu0 %v589_v54 }
  0x20   :  { %252 = vmatprep.subr.bf16.mxu0 %v645_v9 }
  0x23   :  { %253 = vmatpush1.bf16.msra.mxu0 %v590_v55 }
  0x24   :  { %254 = vmatprep.subr.bf16.mxu0 %v645_v9 }
  0x27   :  { %255 = vmatpush1.bf16.msra.mxu0 %v591_v56 }
  0x7b   :  { %v554_v57 = vpop.permute.xlu0 %553  ;;  %v564_v58 = vpop.permute.xlu1 %563 }
  0x7c   :  { %v556_v59 = vunpack.i.h.bf16 %v554_v57  ;;  %v555_v60 = vunpack.i.l.bf16 %v554_v57  ;;  %v566_v61 = vunpack.i.h.bf16 %v564_v58  ;;  %v565_v62 = vunpack.i.l.bf16 %v564_v58 }
  0x7e   :  { %v126_v10 = vsel %vm124_vm4, %v711_v1, %v556_v59  ;;  %v125_v9 = vsel %vm124_vm4, %v706_v0, %v555_v60 }
  0x7f   :  { %v559_v63 = vpop.permute.xlu0 %558  ;;  %v569_v3 = vpop.permute.xlu1 %568 }
  0x80   :  { %v561_v4 = vunpack.i.h.bf16 %v559_v63  ;;  %v560_v5 = vunpack.i.l.bf16 %v559_v63  ;;  %v571_v6 = vunpack.i.h.bf16 %v569_v3  ;;  %v570_v7 = vunpack.i.l.bf16 %v569_v3 }
  0x82   :  { %v130_v11 = vsel %vm129_vm5, %v125_v9, %v560_v5  ;;  %v131_v12 = vsel %vm129_vm5, %v126_v10, %v561_v4  ;;  %v128_v17 = vsel %vm124_vm4, %v725_v8, %v571_v6  ;;  %v127_v18 = vsel %vm124_vm4, %v716_v2, %v570_v7  ;;  %v592_v2 = vld [vmem:[%s882_s4] sm:$0xff]  }
  0x83   :  { %v574_v13 = vpop.permute.xlu0 %573  ;;  %v579_v14 = vpop.permute.xlu1 %578  ;;  %v135_v15 = vsel %vm134_vm6, %v130_v11, %v565_v62  ;;  %v136_v16 = vsel %vm134_vm6, %v131_v12, %v566_v61  ;;  %527 = vmatpush3.bf16.msra.mxu1 %v592_v2 }
  0x84   :  { %v576_v1 = vunpack.i.h.bf16 %v574_v13  ;;  %v575_v19 = vunpack.i.l.bf16 %v574_v13  ;;  %v139_v20 = vpack.c.bf16 %v136_v16, %v135_v15  ;;  %v581_v0 = vunpack.i.h.bf16 %v579_v14  ;;  %528 = vmatprep.subr.bf16.mxu1 %v649_v26  ;;  %v595_v15 = vld [vmem:[%s884_s6] sm:$0xff]  }
  0x85   :  { %v580_v21 = vunpack.i.l.bf16 %v579_v14 }
  0x86   :  { %v133_v22 = vsel %vm129_vm5, %v128_v17, %v576_v1  ;;  %v132_v23 = vsel %vm129_vm5, %v127_v18, %v575_v19  ;;  %269 = vmatmul.mubr.bf16.vlgmr.msra.gmra.mrb[0].mxu0 %v139_v20  ;;  %v596_v17 = vld [vmem:[%s884_s6 + $0x8] sm:$0xff]   ;;  %v510_v18 = vld [vmem:[%s883_s5] ss:$0 sm:$0xff]  ;;  %s597_s6 = scalar_lea.vmem %s486_s11, 32 }
  0x87   :  { %509 = vmatprep.mubr.msk.bf16.mxu0 %vm124_vm4, %v142_v50  ;;  %v137_v24 = vsel %vm134_vm6, %v132_v23, %v580_v21  ;;  %v138_v25 = vsel %vm134_vm6, %v133_v22, %v581_v0  ;;  %529 = vmatpush3.bf16.msra.mxu1 %v593_v27  ;;  %p598_p0 = scmp.ne.s32.totalorder %s486_s11, %s597_s6  ;;  %p603_p2 = scmp.lt.s32.totalorder %s597_s6, %s597_s6 }
  0x88   :  { %v141_v8 = vpack.c.bf16 %v138_v25, %v137_v24  ;;  %530 = vmatprep.subr.bf16.mxu1 %v649_v26 }
  0x89   :  { %p604_p3 = por %p603_p2, %p602_p1 }
  0x8b   :  { %531 = vmatpush3.bf16.msra.mxu1 %v594_v28  ;;  %p605_p4 = pnand %p604_p3, %p598_p0 }
  0x8c   :  { %536 = vmatprep.subr.bf16.mxu1 %v649_v26 }
  0x8e   :  { %277 = vmatmul.mubr.bf16.gmra.mrb[4].mxu0 %v141_v8 }
 0x159   :  { %v270_v30 = vpop.f32.mrb[0].mxu0 }
 0x15a   :  { %v271_v31 = vadd.f32 %v497_v29, %v270_v30  ;;  %v272_v32 = vpop.f32.mrb[1].mxu0 }
 0x15b   :  { %v273_v34 = vpop.f32.mrb[2].mxu0 }
 0x15c   :  { %v285_v35 = vmax.f32 %v271_v31, 0.0  ;;  %v274_v36 = vadd.f32 %v497_v29, %v273_v34  ;;  %v275_v37 = vpop.f32.mrb[3].mxu0 }
 0x15e   :  { %v291_v39 = vadd.f32 %v289_v33, %v285_v35  ;;  %v286_v40 = vmax.f32 %v274_v36, 0.0 }
 0x160   :  { %v292_v41 = vadd.f32 %v290_v38, %v286_v40  ;;  %v296_v43 = vsel %vm295_vm8, %v291_v39, -inf }
 0x161   :  { %v278_v42 = vpop.f32.mrb[4].mxu0 }
 0x162   :  { %v297_v44 = vsel %vm295_vm8, %v292_v41, -inf  ;;  %v279_v45 = vadd.f32 %v497_v29, %v278_v42  ;;  %v280_v46 = vpop.f32.mrb[5].mxu0 }
 0x163   :  { %v298_v47 = vmax.f32 %v296_v43, %v297_v44  ;;  %v281_v48 = vpop.f32.mrb[6].mxu0 }
 0x164   :  { %v287_v49 = vmax.f32 %v279_v45, 0.0  ;;  %v282_v50 = vadd.f32 %v497_v29, %v281_v48  ;;  %v283_v51 = vpop.f32.mrb[7].mxu0 }
 0x165   :  { %v299_v52 = vrot.slane %v298_v47, 4 }
 0x166   :  { %v293_v53 = vadd.f32 %v289_v33, %v287_v49  ;;  %v288_v54 = vmax.f32 %v282_v50, 0.0 }
 0x167   :  { %v300_v55 = vmax.f32 %v298_v47, %v299_v52 }
 0x168   :  { %v294_v56 = vadd.f32 %v290_v38, %v288_v54  ;;  %v305_v58 = vsel %vm295_vm8, %v293_v53, -inf }
 0x169   :  { %v301_v57 = vrot.slane %v300_v55, 2 }
 0x16a   :  { %v306_v59 = vsel %vm295_vm8, %v294_v56, -inf }
 0x16b   :  { %v302_v60 = vmax.f32 %v300_v55, %v301_v57  ;;  %v307_v61 = vmax.f32 %v305_v58, %v306_v59 }
 0x16d   :  { %v308_v62 = vrot.slane %v307_v61, 4  ;;  %v303_v63 = vrot.slane %v302_v60, 1 }
 0x16f   :  { %v309_v3 = vmax.f32 %v307_v61, %v308_v62  ;;  %v304_v5 = vmax.f32 %v302_v60, %v303_v63 }
 0x171   :  { %v310_v4 = vrot.slane %v309_v3, 2  ;;  %v314_v10 = vpack.c.bf16 %v304_v5, %v304_v5 }
 0x173   :  { %v311_v6 = vmax.f32 %v309_v3, %v310_v4  ;;  %v331_v12 = vunpack.c.l.b16 %v314_v10 }
 0x175   :  { %v312_v7 = vrot.slane %v311_v6, 1 }
 0x177   :  { %v313_v9 = vmax.f32 %v311_v6, %v312_v7 }
 0x179   :  { %v315_v11 = vpack.c.bf16 %v313_v9, %v313_v9 }
 0x17b   :  { %v332_v13 = vunpack.c.l.b16 %v315_v11 }
 0x17d   :  { %v334_v14 = vsel %vm333_vm9, %v332_v13, %v331_v12 }
 0x17e   :  { %v335_v16 = vpack.c.b16 %v334_v14, %v334_v14 }
 0x180   :  { %533 = vmatmul.mubr.msk.bf16.vlgmr.msra.gmra.mrb[0].mxu1 %vm295_vm8, %v335_v16 }
 0x181   :  { %537 = vmatpush3.bf16.msra.mxu1 %v595_v15  ;;  %540 = vmatprep.mubr.msk.bf16.mxu1 %vm650_vm7, %v649_v26 }
 0x182   :  { %538 = vmatprep.subr.bf16.mxu1 %v649_v26 }
 0x185   :  { %539 = vmatpush3.bf16.msra.mxu1 %v596_v17 }
 0x253   :  { %v391_v1 = vpop.f32.mrb[0].mxu1 }
 0x254   :  { %v392_v19 = vadd.f32 %v510_v18, %v391_v1  ;;  %v534_v20 = vpop.f32.mrb[1].mxu1 }
 0x255   :  { %v394_v0 = vpop.f32.mrb[2].mxu1 }
 0x256   :  { %v397_v21 = vmax.f32 %v392_v19, 0.0  ;;  %v535_v22 = vpop.f32.mrb[3].mxu1 }
 0x258   :  { %v400_v23 = vpack.c.bf16 %v397_v21, %v397_v21  ;;  %399 = vst.msk [vmem:[#allocation4] sm:$0x3] %vm398_vm10, %v397_v21 }
 0x25a   :  { %541 = vmatmul.mubr.msk.bf16.vlgmr.msra.gmra.mrb[4].mxu1 %vm124_vm4, %v400_v23 }
 0x25b   :  { %608 = shalt.err (!%p605_p4)
}
 0x25c   :  { %s609_s13 = scalar_lea.hbm %s887_s9, 32 }
 0x25d   :  { %p610_p5 = scmp.ne.s32.totalorder %s887_s9, %s609_s13  ;;  %p613_p6 = scmp.lt.u32.totalorder %s609_s13, %s887_s9 }
 0x25f   :  { %p615_p7 = pnand %p613_p6, %p610_p5 }
 0x261   :  { %618 = shalt.err (!%p615_p7)
}
 0x262   :  { %488 = dma.vmem_to_hbm [thread:$0]  %s486_s11, 32, %s887_s9, [#allocation5]   ;;  %v515_v24 = vld [vmem:[%s885_s7] ss:$0 sm:$0xff]  ;;  %vm467_vm11 = vcmask 25600  }
 0x263   :  { %s652_s20 = smov [#allocation2]  }
 0x264   :  { %s475_s21 = sshll.u32 %s652_s20, 4  ;;  %s476_s21 = int_to_ptr.vmem [resolvable:$true] %s475_s21 }
 0x265   :  { %s619_s22 = scalar_lea.vmem %s476_s21, 32  ;;  %p624_p9 = scmp.lt.s32.totalorder %s476_s21, %s476_s21 }
 0x266   :  { %p620_p8 = scmp.ne.s32.totalorder %s476_s21, %s619_s22  ;;  %p625_p10 = scmp.lt.s32.totalorder %s619_s22, %s619_s22 }
 0x268   :  { %p626_p11 = por %p625_p10, %p624_p9 }
 0x26a   :  { %p627_p12 = pnand %p626_p11, %p620_p8 }
 0x32d   :  { %v461_v25 = vpop.f32.mrb[4].mxu1 }
 0x32e   :  { %v462_v8 = vadd.f32 %v515_v24, %v461_v25  ;;  %v542_v2 = vpop.f32.mrb[5].mxu1 }
 0x32f   :  { %v464_v26 = vpop.f32.mrb[6].mxu1 }
 0x330   :  { %v543_v27 = vpop.f32.mrb[7].mxu1  ;;  %468 = vst.msk [vmem:[#allocation2] sm:$0x3] %vm467_vm11, %v462_v8 }
 0x331   :  { %630 = shalt.err (!%p627_p12)
}
 0x332   :  { %s631_s7 = scalar_lea.hbm %s886_s8, 32 }
 0x333   :  { %p632_p13 = scmp.ne.s32.totalorder %s886_s8, %s631_s7  ;;  %p635_p0 = scmp.lt.u32.totalorder %s631_s7, %s886_s8 }
 0x335   :  { %p637_p1 = pnand %p635_p0, %p632_p13 }
 0x337   :  { %640 = shalt.err (!%p637_p1)
}
 0x338   :  { %478 = dma.vmem_to_hbm [thread:$0]  %s476_s21, 32, %s886_s8, [#allocation3]  }
 0x339   :  { %641 = dma.done.wait [#allocation3], 32  }
 0x33a   :  { %642 = vsyncadd [#allocation3], 4294967264 }
 0x33b   :  { %643 = dma.done.wait [#allocation5], 32  }
 0x33c   :  { %644 = vsyncadd [#allocation5], 4294967264 }
 0x33d   :  { %495 = vsyncpa [#allocation3], 1 }
 0x33e   :  { %496 = vsyncpa [#allocation5], 1 }

</bundles_post_ra>
